<compile_context>
chip_gen: v5e
topology: v5e:2x2
jax: 0.10.0
libtpu: 0.0.40
codegen_flags: <defaults>
</compile_context>

<pallas_src>
import jax
import jax.numpy as jnp
from jax.experimental import pallas as pl
from jax.experimental.pallas import tpu as pltpu


_TAPS = tuple((dh, dw) for dh in (-1, 0, 1) for dw in (-1, 0, 1))

# Use the MXU for the 1x1 convs only when channel counts are large enough that
# the VPU broadcast-MAC loop would saturate the 4 VALU slots.
_MXU_CHANNEL_THRESHOLD = 64


def _silu(y):
    # silu(y) = y*sigmoid(y) = 0.5*y*(1 + tanh(0.5*y)); single EUP op.
    return 0.5 * y * (1.0 + jnp.tanh(0.5 * y))


def _tree_sum(terms):
    terms = list(terms)
    while len(terms) > 1:
        nxt = [terms[i] + terms[i + 1] for i in range(0, len(terms) - 1, 2)]
        if len(terms) % 2:
            nxt.append(terms[-1])
        terms = nxt
    return terms[0]


# ----------------------------------------------------------------------------
# Fused bottleneck kernel.  Layout inside the kernel: (R, HW) with
# R = batch_tile*C packed rows on sublanes and H*W on lanes (lane-dense).
# ----------------------------------------------------------------------------
def _make_bottleneck_kernel(R, R_h, H, W, use_mxu):
    HW = H * W
    shifts = tuple(dh * W + dw for (dh, dw) in _TAPS)

    def kernel(x_ref, mask_ref, wt0_ref, wt3_ref, w1t_ref, b1_ref, w2t_ref,
               bplane_ref, o_ref):
        x = x_ref[...].astype(jnp.float32)                       # (R, HW)

        def dw3x3(v, wt_ref, extra=None):
            # Each tap is a circular lane roll (XLU); wrap-around is zeroed by
            # the shared edge mask; per-row tap scalars carry weight*bn_scale.
            terms = []
            for t in range(9):
                s = shifts[t]
                vt = v if s == 0 else pltpu.roll(v, shift=(-s) % HW, axis=1)
                terms.append(wt_ref[:, t:t + 1] * (mask_ref[t:t + 1, :] * vt))
            if extra is not None:
                terms.append(extra)
            return _tree_sum(terms)

        # conv0: depthwise 3x3 * bn_scale (bn bias folded into b1 below).
        y0 = dw3x3(x, wt0_ref)

        # conv1: 1x1 (no norm) + SiLU.
        if use_mxu:
            h = jnp.dot(w1t_ref[...], y0,
                        preferred_element_type=jnp.float32) + b1_ref[...]
        else:
            h = b1_ref[...] + w1t_ref[:, 0:1] * y0[0:1, :]
            for i in range(1, R):
                h = h + w1t_ref[:, i:i + 1] * y0[i:i + 1, :]
        h = _silu(h)                                             # (R_h, HW)

        # conv2: 1x1 (bn scale folded into w2t, bn bias folded into bplane).
        if use_mxu:
            y2 = jnp.dot(w2t_ref[...], h, preferred_element_type=jnp.float32)
        else:
            y2 = w2t_ref[:, 0:1] * h[0:1, :]
            for j in range(1, R_h):
                y2 = y2 + w2t_ref[:, j:j + 1] * h[j:j + 1, :]

        # conv3: depthwise 3x3; residual + (bias2-through-conv3 + bias3) plane
        # folded into one reduction leaf; then final SiLU.
        y3 = dw3x3(y2, wt3_ref, extra=x + bplane_ref[...])
        o_ref[...] = _silu(y3).astype(o_ref.dtype)

    return kernel


def _edge_masks(H, W):
    """Per-tap {0,1} mask over the flattened H*W lane dim (zero padding)."""
    hh = jnp.arange(H).reshape(H, 1)
    ww = jnp.arange(W).reshape(1, W)
    ms = []
    for dh, dw in _TAPS:
        m = ((hh + dh >= 0) & (hh + dh < H) & (ww + dw >= 0) & (ww + dw < W))
        ms.append(m.astype(jnp.float32).reshape(H * W))
    return jnp.stack(ms)                                         # (9, HW)


def _block_diag(m, reps):
    """(a, b) -> (reps*a, reps*b) block-diagonal (per-batch 1x1 weights)."""
    eye = jnp.eye(reps, dtype=m.dtype)
    a, b = m.shape
    return jnp.einsum("nm,ij->nimj", eye, m).reshape(reps * a, reps * b)


def bottleneck_forward(x_nchw, p, batch_tile=None):
    N, C, H, W = x_nchw.shape
    HW = H * W
    hidden = p["w1"].shape[1]
    C_out = p["w2"].shape[1]
    assert C_out == C, "use_add path requires in_channels == out_channels"

    # Pack batch onto sublanes.  Default: all batches in one grid step (best on
    # single-TC v5e/v6e and at overhead-bound shapes).  On v7x with larger N,
    # pass batch_tile = N // 2 to keep both TensorCores busy.
    bt = N if batch_tile is None else batch_tile
    assert N % bt == 0
    n_tiles = N // bt
    R = bt * C                         # packed in/out rows per grid step
    R_h = bt * hidden                  # packed hidden rows per grid step
    use_mxu = max(C, hidden) >= _MXU_CHANNEL_THRESHOLD

    # Activations stay in the caller's dtype in HBM (no f32 blow-up of traffic).
    x = x_nchw.reshape(N * C, HW)

    f32 = jnp.float32
    masks = _edge_masks(H, W)                                    # (9, HW)

    # Depthwise tap scalars with BN scale folded, tiled over the batch tile:
    # row r = n*C + c holds wt[t, c] at lane t.
    wt0 = (p["w0"].reshape(9, C).astype(f32) * p["scale0"][None, :])
    wt3 = (p["w3"].reshape(9, C_out).astype(f32) * p["scale3"][None, :])
    wt0_r = jnp.tile(wt0.T, (bt, 1))                             # (R, 9)
    wt3_r = jnp.tile(wt3.T, (bt, 1))                             # (R, 9)

    # 1x1 weights, transposed + block-diagonal over the packed batch tile.
    w1t = p["w1"].astype(f32).T                                  # (hidden, C)
    w2t = (p["w2"].astype(f32) * p["scale2"][None, :]).T         # (C_out, hidden)
    W1T = _block_diag(w1t, bt)                                   # (R_h, R)
    W2T = _block_diag(w2t, bt)                                   # (R,  R_h)

    # conv0 BN bias folded through conv1: b1 = w1.T @ bias0 (position-independent).
    b1 = w1t @ p["bias0"].astype(f32)                            # (hidden,)
    b1_r = jnp.tile(b1, (bt,)).reshape(R_h, 1)

    # conv2 BN bias folded through the (linear) conv3, plus conv3 BN bias:
    #   plane[c, pos] = bias3[c] + bias2[c] * sum_t wt3[t, c] * mask[t, pos]
    dw3_of_b2 = (p["bias2"].astype(f32)[None, :, None]
                 * wt3[:, :, None] * masks[:, None, :]).sum(axis=0)   # (C_out, HW)
    bias_plane = p["bias3"].astype(f32)[:, None] + dw3_of_b2
    bias_plane_r = jnp.tile(bias_plane, (bt, 1))                 # (R, HW)

    kernel = _make_bottleneck_kernel(R, R_h, H, W, use_mxu)
    out = pl.pallas_call(
        kernel,
        out_shape=jax.ShapeDtypeStruct((N * C, HW), x_nchw.dtype),
        grid=(n_tiles,),
        in_specs=[
            pl.BlockSpec((R, HW), lambda n: (n, 0)),             # x (packed)
            pl.BlockSpec((9, HW), lambda n: (0, 0)),             # edge masks
            pl.BlockSpec((R, 9), lambda n: (0, 0)),              # dw0 tap scalars
            pl.BlockSpec((R, 9), lambda n: (0, 0)),              # dw3 tap scalars
            pl.BlockSpec((R_h, R), lambda n: (0, 0)),            # conv1 weight^T
            pl.BlockSpec((R_h, 1), lambda n: (0, 0)),            # conv1 bias (b1)
            pl.BlockSpec((R, R_h), lambda n: (0, 0)),            # conv2 weight^T
            pl.BlockSpec((R, HW), lambda n: (0, 0)),             # folded bias plane
        ],
        out_specs=pl.BlockSpec((R, HW), lambda n: (n, 0)),
        compiler_params=pltpu.CompilerParams(
            dimension_semantics=("parallel",)),
    )(x, masks, wt0_r, wt3_r, W1T, b1_r, W2T, bias_plane_r)

    return out.reshape(N, C_out, H, W)


# ----------------------------------------------------------------------------
# Pure-JAX reference (for correctness checking).
# ----------------------------------------------------------------------------
def bottleneck_reference(x_nchw, p):
    x = jnp.transpose(x_nchw, (0, 2, 3, 1))

    def dw(inp, w, s, b):
        y = jax.lax.conv_general_dilated(
            inp, w.reshape(3, 3, 1, -1), (1, 1), "SAME",
            dimension_numbers=("NHWC", "HWIO", "NHWC"),
            feature_group_count=inp.shape[-1])
        return y * s.reshape(1, 1, 1, -1) + b.reshape(1, 1, 1, -1)

    y = dw(x, p["w0"], p["scale0"], p["bias0"])
    y = jnp.einsum("nhwc,cd->nhwd", y, p["w1"])
    y = y * jax.nn.sigmoid(y)
    y = jnp.einsum("nhwc,cd->nhwd", y, p["w2"])
    y = y * p["scale2"].reshape(1, 1, 1, -1) + p["bias2"].reshape(1, 1, 1, -1)
    y = dw(y, p["w3"], p["scale3"], p["bias3"])
    y = y + x
    y = y * jax.nn.sigmoid(y)
    return jnp.transpose(y, (0, 3, 1, 2))


def make_params(key, in_ch, out_ch, expansion=0.5, eps=1e-5):
    hidden = int(out_ch * expansion)
    ks = jax.random.split(key, 16)

    def bn_fold(kg, kb, km, kv, c):
        gamma = jax.random.normal(kg, (c,), jnp.float32) * 0.1 + 1.0
        beta = jax.random.normal(kb, (c,), jnp.float32) * 0.1
        mean = jax.random.normal(km, (c,), jnp.float32) * 0.1
        var = jnp.abs(jax.random.normal(kv, (c,), jnp.float32)) * 0.1 + 1.0
        scale = gamma / jnp.sqrt(var + eps)
        bias = beta - mean * scale
        return scale, bias

    p = {}
    p["w0"] = jax.random.normal(ks[0], (3, 3, in_ch), jnp.float32) * 0.2
    p["scale0"], p["bias0"] = bn_fold(ks[1], ks[2], ks[3], ks[4], in_ch)
    p["w1"] = jax.random.normal(ks[5], (in_ch, hidden), jnp.float32) * 0.2
    p["w2"] = jax.random.normal(ks[6], (hidden, out_ch), jnp.float32) * 0.2
    p["scale2"], p["bias2"] = bn_fold(ks[7], ks[8], ks[9], ks[10], out_ch)
    p["w3"] = jax.random.normal(ks[11], (3, 3, out_ch), jnp.float32) * 0.2
    p["scale3"], p["bias3"] = bn_fold(ks[12], ks[13], ks[14], ks[15], out_ch)
    return p


if __name__ == "__main__":
    key = jax.random.PRNGKey(0)
    k_x, k_p = jax.random.split(key)

    N, C, H, W = 2, 4, 16, 16            # in_channels == out_channels -> use_add
    x = jax.random.normal(k_x, (N, C, H, W), jnp.float32)
    params = make_params(k_p, in_ch=C, out_ch=C, expansion=0.5)

    out = jax.jit(bottleneck_forward)(x, params)
    out = jax.block_until_ready(out)

    ref = bottleneck_reference(x, params)
    assert out.shape == (N, C, H, W)
    err = float(jnp.max(jnp.abs(out - ref)))
    assert jnp.allclose(out, ref, atol=1e-4, rtol=1e-4), err

    print("KERNEL_OK")
</pallas_src>

<mosaic_0001>
module attributes {stable_mosaic.version = 11 : i64} {
  func.func @kernel(%arg0: i32, %arg1: memref<8x256xf32, #tpu.memory_space<vmem>>, %arg2: memref<9x256xf32, #tpu.memory_space<vmem>>, %arg3: memref<8x9xf32, #tpu.memory_space<vmem>>, %arg4: memref<8x9xf32, #tpu.memory_space<vmem>>, %arg5: memref<4x8xf32, #tpu.memory_space<vmem>>, %arg6: memref<4x1xf32, #tpu.memory_space<vmem>>, %arg7: memref<8x4xf32, #tpu.memory_space<vmem>>, %arg8: memref<8x256xf32, #tpu.memory_space<vmem>>, %arg9: memref<8x256xf32, #tpu.memory_space<vmem>>) attributes {dimension_semantics = [#tpu.dimension_semantics<parallel>], iteration_bounds = array<i64: 1>, scalar_prefetch = 0 : i64, scratch_operands = 0 : i64, tpu.core_type = #tpu.core_type<tc>, window_params = [{transform_indices = @transform_0, window_bounds = array<i64: 8, 256>}, {pipeline_mode = #tpu.pipeline_mode<synchronous>, transform_indices = @transform_1, window_bounds = array<i64: 9, 256>}, {pipeline_mode = #tpu.pipeline_mode<synchronous>, transform_indices = @transform_2, window_bounds = array<i64: 8, 9>}, {pipeline_mode = #tpu.pipeline_mode<synchronous>, transform_indices = @transform_3, window_bounds = array<i64: 8, 9>}, {pipeline_mode = #tpu.pipeline_mode<synchronous>, transform_indices = @transform_4, window_bounds = array<i64: 4, 8>}, {pipeline_mode = #tpu.pipeline_mode<synchronous>, transform_indices = @transform_5, window_bounds = array<i64: 4, 1>}, {pipeline_mode = #tpu.pipeline_mode<synchronous>, transform_indices = @transform_6, window_bounds = array<i64: 8, 4>}, {pipeline_mode = #tpu.pipeline_mode<synchronous>, transform_indices = @transform_7, window_bounds = array<i64: 8, 256>}, {transform_indices = @transform_8, window_bounds = array<i64: 8, 256>}]} {
    %c0 = arith.constant 0 : index
    %c0_0 = arith.constant 0 : index
    %0 = vector.load %arg1[%c0, %c0_0] : memref<8x256xf32, #tpu.memory_space<vmem>>, vector<8x256xf32>
    %c17_i32 = arith.constant 17 : i32
    %1 = tpu.dynamic_rotate %0 by %c17_i32 dim 1 : vector<8x256xf32>, i32 -> vector<8x256xf32>
    %c0_1 = arith.constant 0 : index
    %c0_2 = arith.constant 0 : index
    %2 = vector.load %arg3[%c0_1, %c0_2] : memref<8x9xf32, #tpu.memory_space<vmem>>, vector<8x1xf32>
    %c0_3 = arith.constant 0 : index
    %c0_4 = arith.constant 0 : index
    %3 = vector.load %arg2[%c0_3, %c0_4] : memref<9x256xf32, #tpu.memory_space<vmem>>, vector<1x256xf32>
    %4 = vector.broadcast %3 : vector<1x256xf32> to vector<8x256xf32>
    %5 = arith.mulf %4, %1 : vector<8x256xf32>
    %6 = vector.broadcast %2 : vector<8x1xf32> to vector<8x256xf32>
    %7 = arith.mulf %6, %5 : vector<8x256xf32>
    %c16_i32 = arith.constant 16 : i32
    %8 = tpu.dynamic_rotate %0 by %c16_i32 dim 1 : vector<8x256xf32>, i32 -> vector<8x256xf32>
    %c0_5 = arith.constant 0 : index
    %c1 = arith.constant 1 : index
    %9 = vector.load %arg3[%c0_5, %c1] : memref<8x9xf32, #tpu.memory_space<vmem>>, vector<8x1xf32>
    %c1_6 = arith.constant 1 : index
    %c0_7 = arith.constant 0 : index
    %10 = vector.load %arg2[%c1_6, %c0_7] : memref<9x256xf32, #tpu.memory_space<vmem>>, vector<1x256xf32>
    %11 = vector.broadcast %10 : vector<1x256xf32> to vector<8x256xf32>
    %12 = arith.mulf %11, %8 : vector<8x256xf32>
    %13 = vector.broadcast %9 : vector<8x1xf32> to vector<8x256xf32>
    %14 = arith.mulf %13, %12 : vector<8x256xf32>
    %c15_i32 = arith.constant 15 : i32
    %15 = tpu.dynamic_rotate %0 by %c15_i32 dim 1 : vector<8x256xf32>, i32 -> vector<8x256xf32>
    %c0_8 = arith.constant 0 : index
    %c2 = arith.constant 2 : index
    %16 = vector.load %arg3[%c0_8, %c2] : memref<8x9xf32, #tpu.memory_space<vmem>>, vector<8x1xf32>
    %c2_9 = arith.constant 2 : index
    %c0_10 = arith.constant 0 : index
    %17 = vector.load %arg2[%c2_9, %c0_10] : memref<9x256xf32, #tpu.memory_space<vmem>>, vector<1x256xf32>
    %18 = vector.broadcast %17 : vector<1x256xf32> to vector<8x256xf32>
    %19 = arith.mulf %18, %15 : vector<8x256xf32>
    %20 = vector.broadcast %16 : vector<8x1xf32> to vector<8x256xf32>
    %21 = arith.mulf %20, %19 : vector<8x256xf32>
    %c1_i32 = arith.constant 1 : i32
    %22 = tpu.dynamic_rotate %0 by %c1_i32 dim 1 : vector<8x256xf32>, i32 -> vector<8x256xf32>
    %c0_11 = arith.constant 0 : index
    %c3 = arith.constant 3 : index
    %23 = vector.load %arg3[%c0_11, %c3] : memref<8x9xf32, #tpu.memory_space<vmem>>, vector<8x1xf32>
    %c3_12 = arith.constant 3 : index
    %c0_13 = arith.constant 0 : index
    %24 = vector.load %arg2[%c3_12, %c0_13] : memref<9x256xf32, #tpu.memory_space<vmem>>, vector<1x256xf32>
    %25 = vector.broadcast %24 : vector<1x256xf32> to vector<8x256xf32>
    %26 = arith.mulf %25, %22 : vector<8x256xf32>
    %27 = vector.broadcast %23 : vector<8x1xf32> to vector<8x256xf32>
    %28 = arith.mulf %27, %26 : vector<8x256xf32>
    %c0_14 = arith.constant 0 : index
    %c4 = arith.constant 4 : index
    %29 = vector.load %arg3[%c0_14, %c4] : memref<8x9xf32, #tpu.memory_space<vmem>>, vector<8x1xf32>
    %c4_15 = arith.constant 4 : index
    %c0_16 = arith.constant 0 : index
    %30 = vector.load %arg2[%c4_15, %c0_16] : memref<9x256xf32, #tpu.memory_space<vmem>>, vector<1x256xf32>
    %31 = vector.broadcast %30 : vector<1x256xf32> to vector<8x256xf32>
    %32 = arith.mulf %31, %0 : vector<8x256xf32>
    %33 = vector.broadcast %29 : vector<8x1xf32> to vector<8x256xf32>
    %34 = arith.mulf %33, %32 : vector<8x256xf32>
    %c255_i32 = arith.constant 255 : i32
    %35 = tpu.dynamic_rotate %0 by %c255_i32 dim 1 : vector<8x256xf32>, i32 -> vector<8x256xf32>
    %c0_17 = arith.constant 0 : index
    %c5 = arith.constant 5 : index
    %36 = vector.load %arg3[%c0_17, %c5] : memref<8x9xf32, #tpu.memory_space<vmem>>, vector<8x1xf32>
    %c5_18 = arith.constant 5 : index
    %c0_19 = arith.constant 0 : index
    %37 = vector.load %arg2[%c5_18, %c0_19] : memref<9x256xf32, #tpu.memory_space<vmem>>, vector<1x256xf32>
    %38 = vector.broadcast %37 : vector<1x256xf32> to vector<8x256xf32>
    %39 = arith.mulf %38, %35 : vector<8x256xf32>
    %40 = vector.broadcast %36 : vector<8x1xf32> to vector<8x256xf32>
    %41 = arith.mulf %40, %39 : vector<8x256xf32>
    %c241_i32 = arith.constant 241 : i32
    %42 = tpu.dynamic_rotate %0 by %c241_i32 dim 1 : vector<8x256xf32>, i32 -> vector<8x256xf32>
    %c0_20 = arith.constant 0 : index
    %c6 = arith.constant 6 : index
    %43 = vector.load %arg3[%c0_20, %c6] : memref<8x9xf32, #tpu.memory_space<vmem>>, vector<8x1xf32>
    %c6_21 = arith.constant 6 : index
    %c0_22 = arith.constant 0 : index
    %44 = vector.load %arg2[%c6_21, %c0_22] : memref<9x256xf32, #tpu.memory_space<vmem>>, vector<1x256xf32>
    %45 = vector.broadcast %44 : vector<1x256xf32> to vector<8x256xf32>
    %46 = arith.mulf %45, %42 : vector<8x256xf32>
    %47 = vector.broadcast %43 : vector<8x1xf32> to vector<8x256xf32>
    %48 = arith.mulf %47, %46 : vector<8x256xf32>
    %c240_i32 = arith.constant 240 : i32
    %49 = tpu.dynamic_rotate %0 by %c240_i32 dim 1 : vector<8x256xf32>, i32 -> vector<8x256xf32>
    %c0_23 = arith.constant 0 : index
    %c7 = arith.constant 7 : index
    %50 = vector.load %arg3[%c0_23, %c7] : memref<8x9xf32, #tpu.memory_space<vmem>>, vector<8x1xf32>
    %c7_24 = arith.constant 7 : index
    %c0_25 = arith.constant 0 : index
    %51 = vector.load %arg2[%c7_24, %c0_25] : memref<9x256xf32, #tpu.memory_space<vmem>>, vector<1x256xf32>
    %52 = vector.broadcast %51 : vector<1x256xf32> to vector<8x256xf32>
    %53 = arith.mulf %52, %49 : vector<8x256xf32>
    %54 = vector.broadcast %50 : vector<8x1xf32> to vector<8x256xf32>
    %55 = arith.mulf %54, %53 : vector<8x256xf32>
    %c239_i32 = arith.constant 239 : i32
    %56 = tpu.dynamic_rotate %0 by %c239_i32 dim 1 : vector<8x256xf32>, i32 -> vector<8x256xf32>
    %c0_26 = arith.constant 0 : index
    %c8 = arith.constant 8 : index
    %57 = vector.load %arg3[%c0_26, %c8] : memref<8x9xf32, #tpu.memory_space<vmem>>, vector<8x1xf32>
    %c8_27 = arith.constant 8 : index
    %c0_28 = arith.constant 0 : index
    %58 = vector.load %arg2[%c8_27, %c0_28] : memref<9x256xf32, #tpu.memory_space<vmem>>, vector<1x256xf32>
    %59 = vector.broadcast %58 : vector<1x256xf32> to vector<8x256xf32>
    %60 = arith.mulf %59, %56 : vector<8x256xf32>
    %61 = vector.broadcast %57 : vector<8x1xf32> to vector<8x256xf32>
    %62 = arith.mulf %61, %60 : vector<8x256xf32>
    %63 = arith.addf %7, %14 : vector<8x256xf32>
    %64 = arith.addf %21, %28 : vector<8x256xf32>
    %65 = arith.addf %34, %41 : vector<8x256xf32>
    %66 = arith.addf %48, %55 : vector<8x256xf32>
    %67 = arith.addf %63, %64 : vector<8x256xf32>
    %68 = arith.addf %65, %66 : vector<8x256xf32>
    %69 = arith.addf %67, %68 : vector<8x256xf32>
    %70 = arith.addf %69, %62 : vector<8x256xf32>
    %c0_29 = arith.constant 0 : index
    %c0_30 = arith.constant 0 : index
    %71 = vector.load %arg6[%c0_29, %c0_30] : memref<4x1xf32, #tpu.memory_space<vmem>>, vector<4x1xf32>
    %c0_31 = arith.constant 0 : index
    %c0_32 = arith.constant 0 : index
    %72 = vector.load %arg5[%c0_31, %c0_32] : memref<4x8xf32, #tpu.memory_space<vmem>>, vector<4x1xf32>
    %73 = vector.extract_strided_slice %70 {offsets = [0, 0], sizes = [1, 256], strides = [1, 1]} : vector<8x256xf32> to vector<1x256xf32>
    %74 = vector.broadcast %72 : vector<4x1xf32> to vector<4x256xf32>
    %75 = vector.broadcast %73 : vector<1x256xf32> to vector<4x256xf32>
    %76 = arith.mulf %74, %75 : vector<4x256xf32>
    %77 = vector.broadcast %71 : vector<4x1xf32> to vector<4x256xf32>
    %78 = arith.addf %77, %76 : vector<4x256xf32>
    %c0_33 = arith.constant 0 : index
    %c1_34 = arith.constant 1 : index
    %79 = vector.load %arg5[%c0_33, %c1_34] : memref<4x8xf32, #tpu.memory_space<vmem>>, vector<4x1xf32>
    %80 = vector.extract_strided_slice %70 {offsets = [1, 0], sizes = [1, 256], strides = [1, 1]} : vector<8x256xf32> to vector<1x256xf32>
    %81 = vector.broadcast %79 : vector<4x1xf32> to vector<4x256xf32>
    %82 = vector.broadcast %80 : vector<1x256xf32> to vector<4x256xf32>
    %83 = arith.mulf %81, %82 : vector<4x256xf32>
    %84 = arith.addf %78, %83 : vector<4x256xf32>
    %c0_35 = arith.constant 0 : index
    %c2_36 = arith.constant 2 : index
    %85 = vector.load %arg5[%c0_35, %c2_36] : memref<4x8xf32, #tpu.memory_space<vmem>>, vector<4x1xf32>
    %86 = vector.extract_strided_slice %70 {offsets = [2, 0], sizes = [1, 256], strides = [1, 1]} : vector<8x256xf32> to vector<1x256xf32>
    %87 = vector.broadcast %85 : vector<4x1xf32> to vector<4x256xf32>
    %88 = vector.broadcast %86 : vector<1x256xf32> to vector<4x256xf32>
    %89 = arith.mulf %87, %88 : vector<4x256xf32>
    %90 = arith.addf %84, %89 : vector<4x256xf32>
    %c0_37 = arith.constant 0 : index
    %c3_38 = arith.constant 3 : index
    %91 = vector.load %arg5[%c0_37, %c3_38] : memref<4x8xf32, #tpu.memory_space<vmem>>, vector<4x1xf32>
    %92 = vector.extract_strided_slice %70 {offsets = [3, 0], sizes = [1, 256], strides = [1, 1]} : vector<8x256xf32> to vector<1x256xf32>
    %93 = vector.broadcast %91 : vector<4x1xf32> to vector<4x256xf32>
    %94 = vector.broadcast %92 : vector<1x256xf32> to vector<4x256xf32>
    %95 = arith.mulf %93, %94 : vector<4x256xf32>
    %96 = arith.addf %90, %95 : vector<4x256xf32>
    %c0_39 = arith.constant 0 : index
    %c4_40 = arith.constant 4 : index
    %97 = vector.load %arg5[%c0_39, %c4_40] : memref<4x8xf32, #tpu.memory_space<vmem>>, vector<4x1xf32>
    %98 = vector.extract_strided_slice %70 {offsets = [4, 0], sizes = [1, 256], strides = [1, 1]} : vector<8x256xf32> to vector<1x256xf32>
    %99 = vector.broadcast %97 : vector<4x1xf32> to vector<4x256xf32>
    %100 = vector.broadcast %98 : vector<1x256xf32> to vector<4x256xf32>
    %101 = arith.mulf %99, %100 : vector<4x256xf32>
    %102 = arith.addf %96, %101 : vector<4x256xf32>
    %c0_41 = arith.constant 0 : index
    %c5_42 = arith.constant 5 : index
    %103 = vector.load %arg5[%c0_41, %c5_42] : memref<4x8xf32, #tpu.memory_space<vmem>>, vector<4x1xf32>
    %104 = vector.extract_strided_slice %70 {offsets = [5, 0], sizes = [1, 256], strides = [1, 1]} : vector<8x256xf32> to vector<1x256xf32>
    %105 = vector.broadcast %103 : vector<4x1xf32> to vector<4x256xf32>
    %106 = vector.broadcast %104 : vector<1x256xf32> to vector<4x256xf32>
    %107 = arith.mulf %105, %106 : vector<4x256xf32>
    %108 = arith.addf %102, %107 : vector<4x256xf32>
    %c0_43 = arith.constant 0 : index
    %c6_44 = arith.constant 6 : index
    %109 = vector.load %arg5[%c0_43, %c6_44] : memref<4x8xf32, #tpu.memory_space<vmem>>, vector<4x1xf32>
    %110 = vector.extract_strided_slice %70 {offsets = [6, 0], sizes = [1, 256], strides = [1, 1]} : vector<8x256xf32> to vector<1x256xf32>
    %111 = vector.broadcast %109 : vector<4x1xf32> to vector<4x256xf32>
    %112 = vector.broadcast %110 : vector<1x256xf32> to vector<4x256xf32>
    %113 = arith.mulf %111, %112 : vector<4x256xf32>
    %114 = arith.addf %108, %113 : vector<4x256xf32>
    %c0_45 = arith.constant 0 : index
    %c7_46 = arith.constant 7 : index
    %115 = vector.load %arg5[%c0_45, %c7_46] : memref<4x8xf32, #tpu.memory_space<vmem>>, vector<4x1xf32>
    %116 = vector.extract_strided_slice %70 {offsets = [7, 0], sizes = [1, 256], strides = [1, 1]} : vector<8x256xf32> to vector<1x256xf32>
    %117 = vector.broadcast %115 : vector<4x1xf32> to vector<4x256xf32>
    %118 = vector.broadcast %116 : vector<1x256xf32> to vector<4x256xf32>
    %119 = arith.mulf %117, %118 : vector<4x256xf32>
    %120 = arith.addf %114, %119 : vector<4x256xf32>
    %cst = arith.constant 5.000000e-01 : f32
    %121 = vector.broadcast %cst : f32 to vector<4x256xf32>
    %122 = arith.mulf %121, %120 : vector<4x256xf32>
    %cst_47 = arith.constant 5.000000e-01 : f32
    %123 = vector.broadcast %cst_47 : f32 to vector<4x256xf32>
    %124 = arith.mulf %123, %120 : vector<4x256xf32>
    %125 = math.tanh %124 : vector<4x256xf32>
    %cst_48 = arith.constant 1.000000e+00 : f32
    %126 = vector.broadcast %cst_48 : f32 to vector<4x256xf32>
    %127 = arith.addf %126, %125 : vector<4x256xf32>
    %128 = arith.mulf %122, %127 : vector<4x256xf32>
    %c0_49 = arith.constant 0 : index
    %c0_50 = arith.constant 0 : index
    %129 = vector.load %arg7[%c0_49, %c0_50] : memref<8x4xf32, #tpu.memory_space<vmem>>, vector<8x1xf32>
    %130 = vector.extract_strided_slice %128 {offsets = [0, 0], sizes = [1, 256], strides = [1, 1]} : vector<4x256xf32> to vector<1x256xf32>
    %131 = vector.broadcast %129 : vector<8x1xf32> to vector<8x256xf32>
    %132 = vector.broadcast %130 : vector<1x256xf32> to vector<8x256xf32>
    %133 = arith.mulf %131, %132 : vector<8x256xf32>
    %c0_51 = arith.constant 0 : index
    %c1_52 = arith.constant 1 : index
    %134 = vector.load %arg7[%c0_51, %c1_52] : memref<8x4xf32, #tpu.memory_space<vmem>>, vector<8x1xf32>
    %135 = vector.extract_strided_slice %128 {offsets = [1, 0], sizes = [1, 256], strides = [1, 1]} : vector<4x256xf32> to vector<1x256xf32>
    %136 = vector.broadcast %134 : vector<8x1xf32> to vector<8x256xf32>
    %137 = vector.broadcast %135 : vector<1x256xf32> to vector<8x256xf32>
    %138 = arith.mulf %136, %137 : vector<8x256xf32>
    %139 = arith.addf %133, %138 : vector<8x256xf32>
    %c0_53 = arith.constant 0 : index
    %c2_54 = arith.constant 2 : index
    %140 = vector.load %arg7[%c0_53, %c2_54] : memref<8x4xf32, #tpu.memory_space<vmem>>, vector<8x1xf32>
    %141 = vector.extract_strided_slice %128 {offsets = [2, 0], sizes = [1, 256], strides = [1, 1]} : vector<4x256xf32> to vector<1x256xf32>
    %142 = vector.broadcast %140 : vector<8x1xf32> to vector<8x256xf32>
    %143 = vector.broadcast %141 : vector<1x256xf32> to vector<8x256xf32>
    %144 = arith.mulf %142, %143 : vector<8x256xf32>
    %145 = arith.addf %139, %144 : vector<8x256xf32>
    %c0_55 = arith.constant 0 : index
    %c3_56 = arith.constant 3 : index
    %146 = vector.load %arg7[%c0_55, %c3_56] : memref<8x4xf32, #tpu.memory_space<vmem>>, vector<8x1xf32>
    %147 = vector.extract_strided_slice %128 {offsets = [3, 0], sizes = [1, 256], strides = [1, 1]} : vector<4x256xf32> to vector<1x256xf32>
    %148 = vector.broadcast %146 : vector<8x1xf32> to vector<8x256xf32>
    %149 = vector.broadcast %147 : vector<1x256xf32> to vector<8x256xf32>
    %150 = arith.mulf %148, %149 : vector<8x256xf32>
    %151 = arith.addf %145, %150 : vector<8x256xf32>
    %c0_57 = arith.constant 0 : index
    %c0_58 = arith.constant 0 : index
    %152 = vector.load %arg8[%c0_57, %c0_58] : memref<8x256xf32, #tpu.memory_space<vmem>>, vector<8x256xf32>
    %153 = arith.addf %0, %152 : vector<8x256xf32>
    %c17_i32_59 = arith.constant 17 : i32
    %154 = tpu.dynamic_rotate %151 by %c17_i32_59 dim 1 : vector<8x256xf32>, i32 -> vector<8x256xf32>
    %c0_60 = arith.constant 0 : index
    %c0_61 = arith.constant 0 : index
    %155 = vector.load %arg4[%c0_60, %c0_61] : memref<8x9xf32, #tpu.memory_space<vmem>>, vector<8x1xf32>
    %c0_62 = arith.constant 0 : index
    %c0_63 = arith.constant 0 : index
    %156 = vector.load %arg2[%c0_62, %c0_63] : memref<9x256xf32, #tpu.memory_space<vmem>>, vector<1x256xf32>
    %157 = vector.broadcast %156 : vector<1x256xf32> to vector<8x256xf32>
    %158 = arith.mulf %157, %154 : vector<8x256xf32>
    %159 = vector.broadcast %155 : vector<8x1xf32> to vector<8x256xf32>
    %160 = arith.mulf %159, %158 : vector<8x256xf32>
    %c16_i32_64 = arith.constant 16 : i32
    %161 = tpu.dynamic_rotate %151 by %c16_i32_64 dim 1 : vector<8x256xf32>, i32 -> vector<8x256xf32>
    %c0_65 = arith.constant 0 : index
    %c1_66 = arith.constant 1 : index
    %162 = vector.load %arg4[%c0_65, %c1_66] : memref<8x9xf32, #tpu.memory_space<vmem>>, vector<8x1xf32>
    %c1_67 = arith.constant 1 : index
    %c0_68 = arith.constant 0 : index
    %163 = vector.load %arg2[%c1_67, %c0_68] : memref<9x256xf32, #tpu.memory_space<vmem>>, vector<1x256xf32>
    %164 = vector.broadcast %163 : vector<1x256xf32> to vector<8x256xf32>
    %165 = arith.mulf %164, %161 : vector<8x256xf32>
    %166 = vector.broadcast %162 : vector<8x1xf32> to vector<8x256xf32>
    %167 = arith.mulf %166, %165 : vector<8x256xf32>
    %c15_i32_69 = arith.constant 15 : i32
    %168 = tpu.dynamic_rotate %151 by %c15_i32_69 dim 1 : vector<8x256xf32>, i32 -> vector<8x256xf32>
    %c0_70 = arith.constant 0 : index
    %c2_71 = arith.constant 2 : index
    %169 = vector.load %arg4[%c0_70, %c2_71] : memref<8x9xf32, #tpu.memory_space<vmem>>, vector<8x1xf32>
    %c2_72 = arith.constant 2 : index
    %c0_73 = arith.constant 0 : index
    %170 = vector.load %arg2[%c2_72, %c0_73] : memref<9x256xf32, #tpu.memory_space<vmem>>, vector<1x256xf32>
    %171 = vector.broadcast %170 : vector<1x256xf32> to vector<8x256xf32>
    %172 = arith.mulf %171, %168 : vector<8x256xf32>
    %173 = vector.broadcast %169 : vector<8x1xf32> to vector<8x256xf32>
    %174 = arith.mulf %173, %172 : vector<8x256xf32>
    %c1_i32_74 = arith.constant 1 : i32
    %175 = tpu.dynamic_rotate %151 by %c1_i32_74 dim 1 : vector<8x256xf32>, i32 -> vector<8x256xf32>
    %c0_75 = arith.constant 0 : index
    %c3_76 = arith.constant 3 : index
    %176 = vector.load %arg4[%c0_75, %c3_76] : memref<8x9xf32, #tpu.memory_space<vmem>>, vector<8x1xf32>
    %c3_77 = arith.constant 3 : index
    %c0_78 = arith.constant 0 : index
    %177 = vector.load %arg2[%c3_77, %c0_78] : memref<9x256xf32, #tpu.memory_space<vmem>>, vector<1x256xf32>
    %178 = vector.broadcast %177 : vector<1x256xf32> to vector<8x256xf32>
    %179 = arith.mulf %178, %175 : vector<8x256xf32>
    %180 = vector.broadcast %176 : vector<8x1xf32> to vector<8x256xf32>
    %181 = arith.mulf %180, %179 : vector<8x256xf32>
    %c0_79 = arith.constant 0 : index
    %c4_80 = arith.constant 4 : index
    %182 = vector.load %arg4[%c0_79, %c4_80] : memref<8x9xf32, #tpu.memory_space<vmem>>, vector<8x1xf32>
    %c4_81 = arith.constant 4 : index
    %c0_82 = arith.constant 0 : index
    %183 = vector.load %arg2[%c4_81, %c0_82] : memref<9x256xf32, #tpu.memory_space<vmem>>, vector<1x256xf32>
    %184 = vector.broadcast %183 : vector<1x256xf32> to vector<8x256xf32>
    %185 = arith.mulf %184, %151 : vector<8x256xf32>
    %186 = vector.broadcast %182 : vector<8x1xf32> to vector<8x256xf32>
    %187 = arith.mulf %186, %185 : vector<8x256xf32>
    %c255_i32_83 = arith.constant 255 : i32
    %188 = tpu.dynamic_rotate %151 by %c255_i32_83 dim 1 : vector<8x256xf32>, i32 -> vector<8x256xf32>
    %c0_84 = arith.constant 0 : index
    %c5_85 = arith.constant 5 : index
    %189 = vector.load %arg4[%c0_84, %c5_85] : memref<8x9xf32, #tpu.memory_space<vmem>>, vector<8x1xf32>
    %c5_86 = arith.constant 5 : index
    %c0_87 = arith.constant 0 : index
    %190 = vector.load %arg2[%c5_86, %c0_87] : memref<9x256xf32, #tpu.memory_space<vmem>>, vector<1x256xf32>
    %191 = vector.broadcast %190 : vector<1x256xf32> to vector<8x256xf32>
    %192 = arith.mulf %191, %188 : vector<8x256xf32>
    %193 = vector.broadcast %189 : vector<8x1xf32> to vector<8x256xf32>
    %194 = arith.mulf %193, %192 : vector<8x256xf32>
    %c241_i32_88 = arith.constant 241 : i32
    %195 = tpu.dynamic_rotate %151 by %c241_i32_88 dim 1 : vector<8x256xf32>, i32 -> vector<8x256xf32>
    %c0_89 = arith.constant 0 : index
    %c6_90 = arith.constant 6 : index
    %196 = vector.load %arg4[%c0_89, %c6_90] : memref<8x9xf32, #tpu.memory_space<vmem>>, vector<8x1xf32>
    %c6_91 = arith.constant 6 : index
    %c0_92 = arith.constant 0 : index
    %197 = vector.load %arg2[%c6_91, %c0_92] : memref<9x256xf32, #tpu.memory_space<vmem>>, vector<1x256xf32>
    %198 = vector.broadcast %197 : vector<1x256xf32> to vector<8x256xf32>
    %199 = arith.mulf %198, %195 : vector<8x256xf32>
    %200 = vector.broadcast %196 : vector<8x1xf32> to vector<8x256xf32>
    %201 = arith.mulf %200, %199 : vector<8x256xf32>
    %c240_i32_93 = arith.constant 240 : i32
    %202 = tpu.dynamic_rotate %151 by %c240_i32_93 dim 1 : vector<8x256xf32>, i32 -> vector<8x256xf32>
    %c0_94 = arith.constant 0 : index
    %c7_95 = arith.constant 7 : index
    %203 = vector.load %arg4[%c0_94, %c7_95] : memref<8x9xf32, #tpu.memory_space<vmem>>, vector<8x1xf32>
    %c7_96 = arith.constant 7 : index
    %c0_97 = arith.constant 0 : index
    %204 = vector.load %arg2[%c7_96, %c0_97] : memref<9x256xf32, #tpu.memory_space<vmem>>, vector<1x256xf32>
    %205 = vector.broadcast %204 : vector<1x256xf32> to vector<8x256xf32>
    %206 = arith.mulf %205, %202 : vector<8x256xf32>
    %207 = vector.broadcast %203 : vector<8x1xf32> to vector<8x256xf32>
    %208 = arith.mulf %207, %206 : vector<8x256xf32>
    %c239_i32_98 = arith.constant 239 : i32
    %209 = tpu.dynamic_rotate %151 by %c239_i32_98 dim 1 : vector<8x256xf32>, i32 -> vector<8x256xf32>
    %c0_99 = arith.constant 0 : index
    %c8_100 = arith.constant 8 : index
    %210 = vector.load %arg4[%c0_99, %c8_100] : memref<8x9xf32, #tpu.memory_space<vmem>>, vector<8x1xf32>
    %c8_101 = arith.constant 8 : index
    %c0_102 = arith.constant 0 : index
    %211 = vector.load %arg2[%c8_101, %c0_102] : memref<9x256xf32, #tpu.memory_space<vmem>>, vector<1x256xf32>
    %212 = vector.broadcast %211 : vector<1x256xf32> to vector<8x256xf32>
    %213 = arith.mulf %212, %209 : vector<8x256xf32>
    %214 = vector.broadcast %210 : vector<8x1xf32> to vector<8x256xf32>
    %215 = arith.mulf %214, %213 : vector<8x256xf32>
    %216 = arith.addf %160, %167 : vector<8x256xf32>
    %217 = arith.addf %174, %181 : vector<8x256xf32>
    %218 = arith.addf %187, %194 : vector<8x256xf32>
    %219 = arith.addf %201, %208 : vector<8x256xf32>
    %220 = arith.addf %215, %153 : vector<8x256xf32>
    %221 = arith.addf %216, %217 : vector<8x256xf32>
    %222 = arith.addf %218, %219 : vector<8x256xf32>
    %223 = arith.addf %221, %222 : vector<8x256xf32>
    %224 = arith.addf %223, %220 : vector<8x256xf32>
    %cst_103 = arith.constant 5.000000e-01 : f32
    %225 = vector.broadcast %cst_103 : f32 to vector<8x256xf32>
    %226 = arith.mulf %225, %224 : vector<8x256xf32>
    %cst_104 = arith.constant 5.000000e-01 : f32
    %227 = vector.broadcast %cst_104 : f32 to vector<8x256xf32>
    %228 = arith.mulf %227, %224 : vector<8x256xf32>
    %229 = math.tanh %228 : vector<8x256xf32>
    %cst_105 = arith.constant 1.000000e+00 : f32
    %230 = vector.broadcast %cst_105 : f32 to vector<8x256xf32>
    %231 = arith.addf %230, %229 : vector<8x256xf32>
    %232 = arith.mulf %226, %231 : vector<8x256xf32>
    %c0_106 = arith.constant 0 : index
    %c0_107 = arith.constant 0 : index
    %233 = vector.load %arg9[%c0_106, %c0_107] : memref<8x256xf32, #tpu.memory_space<vmem>>, vector<8x256xf32>
    tpu.vector_store %arg9[%c0_106, %c0_107], %232 {strides = array<i32>} : memref<8x256xf32, #tpu.memory_space<vmem>>, vector<8x256xf32>,
    return
  }
  func.func @transform_0(%arg0: i32) -> (i32, i32) {
    %c0_i32 = arith.constant 0 : i32
    %c0_i32_0 = arith.constant 0 : i32
    return %arg0, %c0_i32 : i32, i32
  }
  func.func @transform_1(%arg0: i32) -> (i32, i32) {
    %c0_i32 = arith.constant 0 : i32
    %c0_i32_0 = arith.constant 0 : i32
    %c0_i32_1 = arith.constant 0 : i32
    return %c0_i32, %c0_i32_0 : i32, i32
  }
  func.func @transform_2(%arg0: i32) -> (i32, i32) {
    %c0_i32 = arith.constant 0 : i32
    %c0_i32_0 = arith.constant 0 : i32
    %c0_i32_1 = arith.constant 0 : i32
    return %c0_i32, %c0_i32_0 : i32, i32
  }
  func.func @transform_3(%arg0: i32) -> (i32, i32) {
    %c0_i32 = arith.constant 0 : i32
    %c0_i32_0 = arith.constant 0 : i32
    %c0_i32_1 = arith.constant 0 : i32
    return %c0_i32, %c0_i32_0 : i32, i32
  }
  func.func @transform_4(%arg0: i32) -> (i32, i32) {
    %c0_i32 = arith.constant 0 : i32
    %c0_i32_0 = arith.constant 0 : i32
    %c0_i32_1 = arith.constant 0 : i32
    return %c0_i32, %c0_i32_0 : i32, i32
  }
  func.func @transform_5(%arg0: i32) -> (i32, i32) {
    %c0_i32 = arith.constant 0 : i32
    %c0_i32_0 = arith.constant 0 : i32
    %c0_i32_1 = arith.constant 0 : i32
    return %c0_i32, %c0_i32_0 : i32, i32
  }
  func.func @transform_6(%arg0: i32) -> (i32, i32) {
    %c0_i32 = arith.constant 0 : i32
    %c0_i32_0 = arith.constant 0 : i32
    %c0_i32_1 = arith.constant 0 : i32
    return %c0_i32, %c0_i32_0 : i32, i32
  }
  func.func @transform_7(%arg0: i32) -> (i32, i32) {
    %c0_i32 = arith.constant 0 : i32
    %c0_i32_0 = arith.constant 0 : i32
    %c0_i32_1 = arith.constant 0 : i32
    return %c0_i32, %c0_i32_0 : i32, i32
  }
  func.func @transform_8(%arg0: i32) -> (i32, i32) {
    %c0_i32 = arith.constant 0 : i32
    %c0_i32_0 = arith.constant 0 : i32
    return %arg0, %c0_i32 : i32, i32
  }
}

</mosaic_0001>

<bundles_post_ra>
// kernel: tile.33
= control target key start
LH: loop header
LB: loop body
LE: loop exit
PB: predicated region body
PF: predicated region fallthrough
CT: control target
= control target key end

     0   :  { %s22_s0 = inlined_call_operand.vmem [shape: f32[2], index: 0, kind: input, shape index: {}]   ;;  %s23_s1 = inlined_call_operand.vmem [shape: f32[2,2], index: 1, kind: output, shape index: {}]  }
   0x1   :  { %v4_v0 = vld [vmem:[%s22_s0] ss:$0 sm:$0xff] }
   0x2   :  { %5 = vst [vmem:[%s23_s1] sm:$0x3] %v4_v0 }

// kernel: tile.0
= control target key start
LH: loop header
LB: loop body
LE: loop exit
PB: predicated region body
PF: predicated region fallthrough
CT: control target
= control target key end

     0   :  { %vm7_vm0 = vcmask 7168   ;;  %s39_s0 = inlined_call_operand.vmem [shape: f32[2,2], index: 0, kind: input, shape index: {}]   ;;  %s40_s1 = inlined_call_operand.vmem [shape: f32[4,1], index: 1, kind: output, shape index: {}]  }
   0x1   :  { %v4_v0 = vld [vmem:[%s39_s0] sm:$0x3]  ;;  %s22_s0 = smov 127  }
   0x2   :  { %5 = vst [vmem:[#allocation1] sm:$0x3] %v4_v0 }
   0x9   :  { %v9_v1 = vld [vmem:[#allocation1] sm:$0x3]  }
   0xa   :  { %v6_v2 = vld [vmem:[#allocation1] sm:$0x3]   ;;  %10 = vrot.lane.b32.xlu0 %v9_v1, %s22_s0 }
   0xb   :  { %8 = vst.msk [vmem:[#allocation0] ss:$2 sm:$0x3] %vm7_vm0, %v6_v2  }
  0x7c   :  { %v11_v3 = vpop.permute.xlu0 %10  }
  0x7d   :  { %14 = vst.msk [vmem:[#allocation0 + $0x1] ss:$2 sm:$0x3] %vm7_vm0, %v11_v3  }
  0x84   :  { %v17_v4 = vld [vmem:[#allocation0] sm:$0xf] }
  0x85   :  { %20 = vst [vmem:[%s40_s1] sm:$0xf] %v17_v4 }

// kernel: tile.39
= control target key start
LH: loop header
LB: loop body
LE: loop exit
PB: predicated region body
PF: predicated region fallthrough
CT: control target
= control target key end

     0   :  { %s72_s0 = inlined_call_operand.vmem [shape: f32[2,4,256], index: 0, kind: input, shape index: {}]   ;;  %s73_s1 = inlined_call_operand.vmem [shape: f32[8,256], index: 1, kind: output, shape index: {}]  }
   0x1   :  { %v32_v0 = vld [vmem:[%s72_s0 + $0xc] sm:$0xf]  ;;  %v33_v1 = vld [vmem:[%s72_s0 + $0x8] sm:$0xf]  ;;  %v34_v2 = vld [vmem:[%s72_s0 + $0x4] sm:$0xf] }
   0x2   :  { %7 = vst [vmem:[#allocation0 + $0x8] sm:$0xf] %v32_v0  ;;  %v16_v3 = vld [vmem:[%s72_s0] sm:$0xf] }
   0x3   :  { %11 = vst [vmem:[#allocation0 + $0x18] sm:$0xf] %v33_v1 }
   0x4   :  { %15 = vst [vmem:[#allocation0] sm:$0xf] %v34_v2 }
   0x5   :  { %17 = vst [vmem:[#allocation0 + $0x10] sm:$0xf] %v16_v3 }
   0x9   :  { %v29_v4 = vld [vmem:[#allocation0 + $0x8] sm:$0xf]  }
   0xa   :  { %v25_v5 = vld [vmem:[#allocation0 + $0x18] sm:$0xf]   ;;  %37 = vst [vmem:[%s73_s1 + $0xc] sm:$0xf] %v29_v4  }
   0xb   :  { %v21_v6 = vld [vmem:[#allocation0] sm:$0xf]   ;;  %36 = vst [vmem:[%s73_s1 + $0x4] sm:$0xf] %v25_v5  }
   0xc   :  { %v18_v7 = vld [vmem:[#allocation0 + $0x10] sm:$0xf]   ;;  %35 = vst [vmem:[%s73_s1 + $0x8] sm:$0xf] %v21_v6  }
   0xd   :  { %19 = vst [vmem:[%s73_s1] sm:$0xf] %v18_v7  }

// kernel: bottleneck_forward.1
= control target key start
LH: loop header
LB: loop body
LE: loop exit
PB: predicated region body
PF: predicated region fallthrough
CT: control target
= control target key end

     0   :  { %v600_v0 = vmov 0   ;;  %v601_v4 = vmov 1   ;;  %s602_s11 = smov 17   ;;  %s603_s12 = smov 16   ;;  %v604_v5 = vmov 4   ;;  %v605_v6 = vmov 5   ;;  %s1037_s2 = inlined_call_operand.vmem [shape: f32[8,9], index: 2, kind: input, shape index: {}]   ;;  %s1038_s0 = inlined_call_operand.vmem [shape: f32[8,256], index: 0, kind: input, shape index: {}]   ;;  %s1039_s5 = inlined_call_operand.vmem [shape: f32[4,1], index: 5, kind: input, shape index: {}]   ;;  %s1040_s4 = inlined_call_operand.vmem [shape: f32[4,8], index: 4, kind: input, shape index: {}]   ;;  %s1041_s6 = inlined_call_operand.vmem [shape: f32[8,4], index: 6, kind: input, shape index: {}]   ;;  %s1042_s3 = inlined_call_operand.vmem [shape: f32[8,9], index: 3, kind: input, shape index: {}]   ;;  %s1043_s1 = inlined_call_operand.vmem [shape: f32[9,256], index: 1, kind: input, shape index: {}]   ;;  %s1044_s7 = inlined_call_operand.vmem [shape: f32[8,256], index: 7, kind: input, shape index: {}]   ;;  %s1045_s8 = inlined_call_operand.vmem [shape: f32[8,256], index: 8, kind: output, shape index: {}]  }
   0x1   :  { %560 = vset.pattern.permute.xlu1 %v600_v0  ;;  %v40_v1 = vld [vmem:[%s1037_s2] sm:$0xff]  ;;  %v674_v3 = vld [vmem:[%s1038_s0 + $0x8] sm:$0xff]  ;;  %561 = vset.pattern.permute.xlu2 %v601_v4  ;;  %v607_v7 = vmov 2   ;;  %s608_s2 = smov 1   ;;  %v609_v8 = vmov 3   ;;  %s610_s13 = smov 127   ;;  %v35_v32 = vlaneseq }
   0x2   :  { %v669_v2 = vld [vmem:[%s1038_s0] sm:$0xff]  ;;  %51 = vperm.xlu1 %560, %v40_v1   ;;  %58 = vrot.lane.b32.xlu2 %v674_v3, %s603_s12  ;;  %s606_s0 = smov 15   ;;  %s611_s14 = smov 113   ;;  %v612_v9 = vmov 6   ;;  %v615_v10 = vmov 7   ;;  %v616_v13 = vmov 8  }
   0x3   :  { %31 = vrot.lane.b32.xlu0 %v669_v2, %s602_s11  ;;  %s613_s15 = smov 112   ;;  %s614_s16 = smov 111   ;;  %v241_v11 = vld [vmem:[%s1039_s5] sm:$0xf]  ;;  %v771_v33 = vand.u32 127, %v35_v32 }
   0x4   :  { %564 = vset.pattern.permute.xlu0 %v604_v5  ;;  %v242_v12 = vld [vmem:[%s1040_s4] sm:$0xf]  ;;  %v788_v37 = vld [vmem:[%s1043_s1 + $0x4] ss:$8 sm:$0x3] }
   0x5   :  { %v337_v14 = vld [vmem:[%s1041_s6] sm:$0xff]  ;;  %vm60_vm0 = vcmp.lt.s32.totalorder %v771_v33, 16  ;;  %vm37_vm1 = vcmp.lt.s32.totalorder %v771_v33, 17  ;;  %v125_v45 = vperm.slane %v788_v37, 0  ;;  %v126_v46 = vperm.slane %v788_v37, 1 }
   0x6   :  { %v735_v15 = vld [vmem:[%s1042_s3] sm:$0xff]  ;;  %vm82_vm2 = vcmp.lt.s32.totalorder %v771_v33, 15  ;;  %vm104_vm3 = vcmp.lt.s32.totalorder %v771_v33, 1  ;;  %vm141_vm4 = vcmp.lt.s32.totalorder %v771_v33, 127  ;;  %vm163_vm5 = vcmp.lt.s32.totalorder %v771_v33, 113 }
   0x7   :  { %v776_v34 = vld [vmem:[%s1043_s1 + $0x1] ss:$8 sm:$0x3]  ;;  %v783_v36 = vld [vmem:[%s1043_s1] ss:$8 sm:$0x3]  ;;  %v130_v59 = vmul.f32 %v126_v46, %v674_v3  ;;  %v129_v60 = vmul.f32 %v125_v45, %v669_v2 }
   0x8   :  { %v793_v38 = vld [vmem:[%s1043_s1 + $0x2] ss:$8 sm:$0x3]  ;;  %v66_v40 = vperm.slane %v776_v34, 0  ;;  %v67_v41 = vperm.slane %v776_v34, 1  ;;  %v43_v42 = vperm.slane %v783_v36, 0 }
   0x9   :  { %v803_v43 = vld [vmem:[%s1043_s1 + $0x3] ss:$8 sm:$0x3]  ;;  %v44_v47 = vperm.slane %v783_v36, 1  ;;  %v88_v48 = vperm.slane %v793_v38, 0  ;;  %v89_v52 = vperm.slane %v793_v38, 1 }
   0xa   :  { %56 = vrot.lane.b32.xlu1 %v669_v2, %s603_s12  ;;  %73 = vperm.xlu2 %561, %v40_v1   ;;  %v813_v49 = vld [vmem:[%s1043_s1 + $0x5] ss:$8 sm:$0x3]  ;;  %v110_v54 = vperm.slane %v803_v43, 0  ;;  %v111_v55 = vperm.slane %v803_v43, 1  ;;  %vm185_vm6 = vcmp.lt.s32.totalorder %v771_v33, 112 }
   0xb   :  { %33 = vrot.lane.b32.xlu0 %v674_v3, %s602_s11  ;;  %565 = vset.pattern.permute.xlu1 %v605_v6  ;;  %v830_v56 = vld [vmem:[%s1043_s1 + $0x6] ss:$8 sm:$0x3]  ;;  %v147_v57 = vperm.slane %v813_v49, 0  ;;  %v148_v58 = vperm.slane %v813_v49, 1  ;;  %vm207_vm7 = vcmp.lt.s32.totalorder %v771_v33, 111 }
  0x12   :  { %80 = vrot.lane.b32.xlu1 %v674_v3, %s606_s0  ;;  %562 = vset.pattern.permute.xlu2 %v607_v7 }
  0x13   :  { %78 = vrot.lane.b32.xlu0 %v669_v2, %s606_s0  ;;  %95 = vperm.xlu2 %562, %v40_v1  }
  0x1a   :  { %102 = vrot.lane.b32.xlu1 %v674_v3, %s608_s2 }
  0x1b   :  { %100 = vrot.lane.b32.xlu0 %v669_v2, %s608_s2  ;;  %563 = vset.pattern.permute.xlu2 %v609_v8 }
  0x1c   :  { %117 = vperm.xlu2 %563, %v40_v1  }
  0x22   :  { %137 = vrot.lane.b32.xlu1 %v669_v2, %s610_s13 }
  0x23   :  { %132 = vperm.xlu0 %564, %v40_v1  }
  0x24   :  { %139 = vrot.lane.b32.xlu2 %v674_v3, %s610_s13 }
  0x25   :  { %569 = vset.pattern.permute.xlu2 %v600_v0 }
  0x2a   :  { %154 = vperm.xlu1 %565, %v40_v1  }
  0x2b   :  { %161 = vrot.lane.b32.xlu0 %v674_v3, %s611_s14 }
  0x2c   :  { %570 = vset.pattern.permute.xlu0 %v600_v0  ;;  %159 = vrot.lane.b32.xlu2 %v669_v2, %s611_s14 }
  0x32   :  { %566 = vset.pattern.permute.xlu1 %v612_v9 }
  0x33   :  { %183 = vrot.lane.b32.xlu0 %v674_v3, %s613_s15  ;;  %176 = vperm.xlu1 %566, %v40_v1  }
  0x34   :  { %181 = vrot.lane.b32.xlu2 %v669_v2, %s613_s15 }
  0x3b   :  { %205 = vrot.lane.b32.xlu0 %v674_v3, %s614_s16  ;;  %567 = vset.pattern.permute.xlu1 %v615_v10 }
  0x3c   :  { %198 = vperm.xlu1 %567, %v40_v1   ;;  %203 = vrot.lane.b32.xlu2 %v669_v2, %s614_s16 }
  0x43   :  { %254 = vperm.xlu0 %570, %v241_v11  }
  0x44   :  { %568 = vset.pattern.permute.xlu1 %v616_v13  ;;  %245 = vperm.xlu2 %569, %v242_v12  }
  0x45   :  { %220 = vperm.xlu1 %568, %v40_v1   ;;  %v851_v1 = vld [vmem:[%s1043_s1 + $0x7] ss:$8 sm:$0x3] }
  0x4b   :  { %575 = vset.pattern.permute.xlu0 %v605_v6 }
  0x4c   :  { %300 = vperm.xlu0 %575, %v242_v12   ;;  %572 = vset.pattern.permute.xlu2 %v607_v7 }
  0x4d   :  { %571 = vset.pattern.permute.xlu1 %v601_v4  ;;  %270 = vperm.xlu2 %572, %v242_v12  }
  0x4e   :  { %260 = vperm.xlu1 %571, %v242_v12  }
  0x54   :  { %580 = vset.pattern.permute.xlu0 %v607_v7 }
  0x55   :  { %358 = vperm.xlu0 %580, %v337_v14   ;;  %574 = vset.pattern.permute.xlu2 %v604_v5 }
  0x56   :  { %573 = vset.pattern.permute.xlu1 %v609_v8  ;;  %290 = vperm.xlu2 %574, %v242_v12  }
  0x57   :  { %280 = vperm.xlu1 %573, %v242_v12  }
  0x5c   :  { %v59_v16 = vpop.permute.xlu2 %58 }
  0x5d   :  { %586 = vset.pattern.permute.xlu0 %v604_v5 }
  0x5e   :  { %577 = vset.pattern.permute.xlu2 %v615_v10  ;;  %442 = vperm.xlu0 %586, %v735_v15  }
  0x5f   :  { %576 = vset.pattern.permute.xlu1 %v612_v9  ;;  %320 = vperm.xlu2 %577, %v242_v12  }
  0x60   :  { %310 = vperm.xlu1 %576, %v242_v12  }
  0x64   :  { %v741_v17 = vpop.permute.xlu2 %73 }
  0x66   :  { %591 = vset.pattern.permute.xlu0 %v616_v13 }
  0x67   :  { %579 = vset.pattern.permute.xlu2 %v601_v4 }
  0x68   :  { %578 = vset.pattern.permute.xlu1 %v600_v0  ;;  %348 = vperm.xlu2 %579, %v337_v14  }
  0x69   :  { %340 = vperm.xlu1 %578, %v337_v14  }
  0x6d   :  { %v750_v20 = vpop.permute.xlu2 %95 }
  0x70   :  { %582 = vset.pattern.permute.xlu2 %v600_v0 }
  0x71   :  { %581 = vset.pattern.permute.xlu1 %v609_v8  ;;  %392 = vperm.xlu2 %582, %v735_v15  }
  0x72   :  { %368 = vperm.xlu1 %581, %v337_v14   ;;  %v192_v14 = vperm.slane %v851_v1, 1 }
  0x74   :  { %v746_v18 = vpop.permute.xlu1 %51 }
  0x75   :  { %v748_v19 = vpop.permute.xlu0 %31 }
  0x76   :  { %v756_v23 = vpop.permute.xlu2 %117 }
  0x79   :  { %583 = vset.pattern.permute.xlu2 %v601_v4 }
  0x7a   :  { %587 = vset.pattern.permute.xlu1 %v605_v6  ;;  %406 = vperm.xlu2 %583, %v735_v15  }
  0x7b   :  { %456 = vperm.xlu1 %587, %v735_v15  }
  0x7c   :  { %v57_v21 = vpop.permute.xlu1 %56 }
  0x7d   :  { %v34_v22 = vpop.permute.xlu0 %33  ;;  %v61_v50 = vsel %vm60_vm0, %v57_v21, %v59_v16  ;;  %v62_v51 = vsel %vm60_vm0, %v59_v16, %v57_v21 }
  0x7e   :  { %v761_v26 = vpop.permute.xlu2 %139  ;;  %v39_v53 = vsel %vm37_vm1, %v34_v22, %v748_v19  ;;  %v70_v61 = vmul.f32 %v66_v40, %v62_v51  ;;  %v71_v62 = vmul.f32 %v67_v41, %v61_v50  ;;  %v38_v63 = vsel %vm37_vm1, %v748_v19, %v34_v22 }
  0x7f   :  { %v47_v4 = vmul.f32 %v43_v42, %v39_v53 }
  0x81   :  { %v54_v50 = vmul.f32 %v746_v18, %v47_v4 }
  0x82   :  { %584 = vset.pattern.permute.xlu2 %v607_v7  ;;  %v169_v7 = vperm.slane %v830_v56, 0 }
  0x83   :  { %589 = vset.pattern.permute.xlu1 %v615_v10  ;;  %420 = vperm.xlu2 %584, %v735_v15   ;;  %v170_v10 = vperm.slane %v830_v56, 1 }
  0x84   :  { %v81_v24 = vpop.permute.xlu1 %80  ;;  %484 = vperm.xlu1 %589, %v735_v15  }
  0x85   :  { %v79_v25 = vpop.permute.xlu0 %78 }
  0x86   :  { %v160_v31 = vpop.permute.xlu2 %159 }
  0x8b   :  { %585 = vset.pattern.permute.xlu2 %v609_v8  ;;  %v83_v8 = vsel %vm82_vm2, %v79_v25, %v81_v24 }
  0x8c   :  { %v103_v27 = vpop.permute.xlu1 %102  ;;  %590 = vset.pattern.permute.xlu1 %v616_v13  ;;  %434 = vperm.xlu2 %585, %v735_v15   ;;  %v191_v13 = vperm.slane %v851_v1, 0  ;;  %v93_v53 = vmul.f32 %v89_v52, %v83_v8  ;;  %v377_v1 = vld [vmem:[%s1044_s7] sm:$0xff] }
  0x8d   :  { %v101_v28 = vpop.permute.xlu0 %100 }
  0x8e   :  { %v182_v44 = vpop.permute.xlu2 %181  ;;  %v105_v5 = vsel %vm104_vm3, %v101_v28, %v103_v27  ;;  %v106_v6 = vsel %vm104_vm3, %v103_v27, %v101_v28  ;;  %v48_v27 = vmul.f32 %v44_v47, %v38_v63 }
  0x8f   :  { %v114_v19 = vmul.f32 %v110_v54, %v106_v6  ;;  %v115_v21 = vmul.f32 %v111_v55, %v105_v5 }
  0x94   :  { %v765_v29 = vpop.permute.xlu1 %137  ;;  %588 = vset.pattern.permute.xlu2 %v612_v9  ;;  %v84_v9 = vsel %vm82_vm2, %v81_v24, %v79_v25  ;;  %v76_v25 = vmul.f32 %v741_v17, %v70_v61 }
  0x95   :  { %v767_v30 = vpop.permute.xlu0 %132  ;;  %470 = vperm.xlu2 %588, %v735_v15   ;;  %v142_v22 = vsel %vm141_vm4, %v765_v29, %v761_v26  ;;  %v143_v24 = vsel %vm141_vm4, %v761_v26, %v765_v29  ;;  %v92_v29 = vmul.f32 %v88_v48, %v84_v9 }
  0x96   :  { %v204_v28 = vpop.permute.xlu2 %203  ;;  %v151_v61 = vmul.f32 %v147_v57, %v142_v22  ;;  %v135_v5 = vmul.f32 %v767_v30, %v129_v60  ;;  %v136_v6 = vmul.f32 %v767_v30, %v130_v59  ;;  %v55_v22 = vmul.f32 %v746_v18, %v48_v27 }
  0x97   :  { %v98_v60 = vmul.f32 %v750_v20, %v92_v29  ;;  %v99_v30 = vmul.f32 %v750_v20, %v93_v53  ;;  %v225_v20 = vadd.f32 %v76_v25, %v54_v50 }
  0x9c   :  { %v778_v35 = vpop.permute.xlu1 %154 }
  0x9d   :  { %v162_v39 = vpop.permute.xlu0 %161  ;;  %v157_v8 = vmul.f32 %v778_v35, %v151_v61 }
  0x9e   :  { %v164_v11 = vsel %vm163_vm5, %v160_v31, %v162_v39  ;;  %v165_v12 = vsel %vm163_vm5, %v162_v39, %v160_v31  ;;  %v77_v39 = vmul.f32 %v741_v17, %v71_v62  ;;  %v152_v17 = vmul.f32 %v148_v58, %v143_v24  ;;  %v246_v53 = vpop.permute.xlu2 %245 }
  0x9f   :  { %v173_v51 = vmul.f32 %v169_v7, %v164_v11  ;;  %v174_v26 = vmul.f32 %v170_v10, %v165_v12  ;;  %v121_v62 = vmul.f32 %v756_v23, %v115_v21  ;;  %v918_v11 = vld [vmem:[%s1043_s1 + $0x10] ss:$8 sm:$0x3] }
  0xa0   :  { %v158_v9 = vmul.f32 %v778_v35, %v152_v17  ;;  %v213_v35 = vperm.slane %v918_v11, 0  ;;  %v214_v59 = vperm.slane %v918_v11, 1  ;;  %v226_v29 = vadd.f32 %v77_v39, %v55_v22 }
  0xa1   :  { %v228_v61 = vadd.f32 %v121_v62, %v99_v30 }
  0xa5   :  { %v177_v0 = vpop.permute.xlu1 %176  ;;  %v184_v16 = vpop.permute.xlu0 %183 }
  0xa6   :  { %v186_v31 = vsel %vm185_vm6, %v182_v44, %v184_v16  ;;  %v187_v32 = vsel %vm185_vm6, %v184_v16, %v182_v44  ;;  %v120_v44 = vmul.f32 %v756_v23, %v114_v19  ;;  %v179_v12 = vmul.f32 %v177_v0, %v173_v51 }
  0xa7   :  { %v195_v63 = vmul.f32 %v191_v13, %v186_v31  ;;  %v196_v4 = vmul.f32 %v192_v14, %v187_v32  ;;  %v180_v16 = vmul.f32 %v177_v0, %v174_v26  ;;  %v229_v51 = vadd.f32 %v157_v8, %v135_v5  ;;  %v271_v50 = vpop.permute.xlu2 %270 }
  0xa8   :  { %v227_v32 = vadd.f32 %v120_v44, %v98_v60  ;;  %v230_v0 = vadd.f32 %v158_v9, %v136_v6 }
  0xad   :  { %v206_v26 = vpop.permute.xlu0 %205 }
  0xae   :  { %v199_v23 = vpop.permute.xlu1 %198  ;;  %v208_v18 = vsel %vm207_vm7, %v204_v28, %v206_v26  ;;  %v209_v27 = vsel %vm207_vm7, %v206_v26, %v204_v28 }
  0xaf   :  { %v201_v19 = vmul.f32 %v199_v23, %v195_v63  ;;  %v202_v21 = vmul.f32 %v199_v23, %v196_v4  ;;  %v233_v4 = vadd.f32 %v227_v32, %v225_v20  ;;  %v234_v23 = vadd.f32 %v228_v61, %v226_v29 }
  0xb0   :  { %v217_v44 = vmul.f32 %v213_v35, %v208_v18  ;;  %v218_v62 = vmul.f32 %v214_v59, %v209_v27  ;;  %v291_v20 = vpop.permute.xlu2 %290 }
  0xb1   :  { %v231_v24 = vadd.f32 %v201_v19, %v179_v12  ;;  %v232_v31 = vadd.f32 %v202_v21, %v180_v16 }
  0xb3   :  { %v235_v17 = vadd.f32 %v231_v24, %v229_v51  ;;  %v236_v63 = vadd.f32 %v232_v31, %v230_v0 }
  0xb5   :  { %v237_v6 = vadd.f32 %v235_v17, %v233_v4  ;;  %v238_v8 = vadd.f32 %v236_v63, %v234_v23  ;;  %v255_v24 = vpop.permute.xlu0 %254 }
  0xb7   :  { %v221_v5 = vpop.permute.xlu1 %220 }
  0xb8   :  { %v223_v9 = vmul.f32 %v221_v5, %v217_v44  ;;  %v224_v12 = vmul.f32 %v221_v5, %v218_v62 }
  0xba   :  { %v239_v16 = vadd.f32 %v237_v6, %v223_v9  ;;  %v240_v28 = vadd.f32 %v238_v8, %v224_v12 }
  0xbc   :  { %v248_v25 = vperm.slane %v239_v16, 0  ;;  %v249_v39 = vperm.slane %v240_v28, 0  ;;  %v263_v60 = vperm.slane %v239_v16, 1  ;;  %v264_v30 = vperm.slane %v240_v28, 1 }
  0xbd   :  { %v273_v0 = vperm.slane %v239_v16, 2  ;;  %v274_v26 = vperm.slane %v240_v28, 2  ;;  %v283_v63 = vperm.slane %v239_v16, 3  ;;  %v284_v4 = vperm.slane %v240_v28, 3 }
  0xbe   :  { %v250_v19 = vmul.f32 %v248_v25, %v246_v53  ;;  %v251_v21 = vmul.f32 %v249_v39, %v246_v53  ;;  %v293_v44 = vperm.slane %v239_v16, 4  ;;  %v294_v53 = vperm.slane %v240_v28, 4 }
  0xbf   :  { %v275_v29 = vmul.f32 %v273_v0, %v271_v50  ;;  %v276_v17 = vmul.f32 %v274_v26, %v271_v50  ;;  %v304_v25 = vperm.slane %v240_v28, 5  ;;  %v303_v39 = vperm.slane %v239_v16, 5  ;;  %v321_v0 = vpop.permute.xlu2 %320 }
  0xc0   :  { %v261_v22 = vpop.permute.xlu1 %260  ;;  %v257_v31 = vadd.f32 %v255_v24, %v250_v19  ;;  %v258_v32 = vadd.f32 %v255_v24, %v251_v21  ;;  %v295_v19 = vmul.f32 %v293_v44, %v291_v20  ;;  %v296_v21 = vmul.f32 %v294_v53, %v291_v20 }
  0xc1   :  { %v265_v61 = vmul.f32 %v263_v60, %v261_v22  ;;  %v266_v51 = vmul.f32 %v264_v30, %v261_v22  ;;  %v301_v22 = vpop.permute.xlu0 %300  ;;  %v323_v24 = vperm.slane %v239_v16, 7  ;;  %v324_v50 = vperm.slane %v240_v28, 7 }
  0xc3   :  { %v267_v18 = vadd.f32 %v265_v61, %v257_v31  ;;  %v268_v27 = vadd.f32 %v266_v51, %v258_v32  ;;  %v305_v31 = vmul.f32 %v303_v39, %v301_v22  ;;  %v306_v32 = vmul.f32 %v304_v25, %v301_v22 }
  0xc4   :  { %v313_v61 = vperm.slane %v239_v16, 6  ;;  %v314_v51 = vperm.slane %v240_v28, 6 }
  0xc5   :  { %v277_v62 = vadd.f32 %v275_v29, %v267_v18  ;;  %v278_v5 = vadd.f32 %v276_v17, %v268_v27 }
  0xc7   :  { %v349_v39 = vpop.permute.xlu2 %348 }
  0xc9   :  { %v281_v23 = vpop.permute.xlu1 %280 }
  0xca   :  { %v285_v6 = vmul.f32 %v283_v63, %v281_v23  ;;  %v286_v8 = vmul.f32 %v284_v4, %v281_v23  ;;  %v325_v63 = vmul.f32 %v323_v24, %v321_v0  ;;  %v326_v4 = vmul.f32 %v324_v50, %v321_v0  ;;  %v359_v50 = vpop.permute.xlu0 %358 }
  0xcc   :  { %v287_v9 = vadd.f32 %v285_v6, %v277_v62  ;;  %v288_v12 = vadd.f32 %v286_v8, %v278_v5 }
  0xce   :  { %v297_v60 = vadd.f32 %v295_v19, %v287_v9  ;;  %v298_v30 = vadd.f32 %v296_v21, %v288_v12 }
  0xd0   :  { %v307_v18 = vadd.f32 %v305_v31, %v297_v60  ;;  %v308_v27 = vadd.f32 %v306_v32, %v298_v30 }
  0xd2   :  { %v311_v26 = vpop.permute.xlu1 %310 }
  0xd3   :  { %v315_v29 = vmul.f32 %v313_v61, %v311_v26  ;;  %v316_v17 = vmul.f32 %v314_v51, %v311_v26 }
  0xd5   :  { %v317_v23 = vadd.f32 %v315_v29, %v307_v18  ;;  %v318_v44 = vadd.f32 %v316_v17, %v308_v27 }
  0xd7   :  { %v327_v20 = vadd.f32 %v325_v63, %v317_v23  ;;  %v328_v53 = vadd.f32 %v326_v4, %v318_v44 }
  0xd9   :  { %v329_v62 = vmul.f32 0.5, %v327_v20  ;;  %v330_v5 = vmul.f32 0.5, %v328_v53 }
  0xdb   :  { %592 = vtanh.f32 %v329_v62  ;;  %v341_v6 = vpop.permute.xlu1 %340 }
  0xdc   :  { %594 = vtanh.f32 %v330_v5 }
  0xe1   :  { %v593_v8 = vpop.eup %592 }
  0xe2   :  { %v595_v16 = vpop.eup %594  ;;  %v333_v28 = vadd.f32 1.0, %v593_v8 }
  0xe3   :  { %v334_v9 = vadd.f32 1.0, %v595_v16 }
  0xe4   :  { %v335_v12 = vmul.f32 %v333_v28, %v329_v62  ;;  %v369_v26 = vpop.permute.xlu1 %368 }
  0xe5   :  { %v336_v25 = vmul.f32 %v334_v9, %v330_v5  ;;  %v393_v5 = vpop.permute.xlu2 %392  ;;  %v443_v9 = vpop.permute.xlu0 %442 }
  0xe6   :  { %v343_v19 = vperm.slane %v335_v12, 0  ;;  %v351_v21 = vperm.slane %v335_v12, 1  ;;  %v361_v22 = vperm.slane %v335_v12, 2  ;;  %v371_v61 = vperm.slane %v335_v12, 3 }
  0xe7   :  { %v344_v60 = vperm.slane %v336_v25, 0  ;;  %v352_v30 = vperm.slane %v336_v25, 1  ;;  %v362_v24 = vperm.slane %v336_v25, 2  ;;  %v372_v18 = vperm.slane %v336_v25, 3 }
  0xe8   :  { %v345_v31 = vmul.f32 %v343_v19, %v341_v6  ;;  %v353_v32 = vmul.f32 %v351_v21, %v349_v39  ;;  %v363_v29 = vmul.f32 %v361_v22, %v359_v50  ;;  %v373_v4 = vmul.f32 %v371_v61, %v369_v26 }
  0xe9   :  { %v346_v51 = vmul.f32 %v344_v60, %v341_v6  ;;  %v354_v0 = vmul.f32 %v352_v30, %v349_v39  ;;  %v364_v63 = vmul.f32 %v362_v24, %v359_v50  ;;  %v374_v44 = vmul.f32 %v372_v18, %v369_v26 }
  0xea   :  { %v355_v27 = vadd.f32 %v353_v32, %v345_v31 }
  0xeb   :  { %v356_v17 = vadd.f32 %v354_v0, %v346_v51 }
  0xec   :  { %v365_v23 = vadd.f32 %v363_v29, %v355_v27 }
  0xed   :  { %v366_v20 = vadd.f32 %v364_v63, %v356_v17  ;;  %v407_v6 = vpop.permute.xlu2 %406  ;;  %v457_v8 = vpop.permute.xlu1 %456 }
  0xee   :  { %v375_v53 = vadd.f32 %v373_v4, %v365_v23 }
  0xef   :  { %v376_v62 = vadd.f32 %v374_v44, %v366_v20 }
  0xf0   :  { %397 = vrot.lane.b32.xlu0 %v375_v53, %s603_s12  ;;  %381 = vrot.lane.b32.xlu2 %v375_v53, %s602_s11  ;;  %v439_v29 = vmul.f32 %v375_v53, %v125_v45 }
  0xf1   :  { %383 = vrot.lane.b32.xlu1 %v376_v62, %s602_s11  ;;  %v440_v27 = vmul.f32 %v376_v62, %v126_v46 }
  0xf5   :  { %v421_v16 = vpop.permute.xlu2 %420 }
  0xf6   :  { %v951_v28 = vpop.permute.xlu1 %484 }
  0xf8   :  { %411 = vrot.lane.b32.xlu0 %v375_v53, %s606_s0  ;;  %447 = vrot.lane.b32.xlu2 %v375_v53, %s610_s13 }
  0xf9   :  { %399 = vrot.lane.b32.xlu1 %v376_v62, %s603_s12 }
  0xfd   :  { %v435_v12 = vpop.permute.xlu2 %434 }
 0x100   :  { %425 = vrot.lane.b32.xlu0 %v375_v53, %s608_s2  ;;  %463 = vrot.lane.b32.xlu2 %v376_v62, %s611_s14 }
 0x101   :  { %413 = vrot.lane.b32.xlu1 %v376_v62, %s606_s0 }
 0x105   :  { %v471_v19 = vpop.permute.xlu2 %470 }
 0x108   :  { %449 = vrot.lane.b32.xlu0 %v376_v62, %s610_s13  ;;  %489 = vrot.lane.b32.xlu2 %v375_v53, %s614_s16 }
 0x109   :  { %427 = vrot.lane.b32.xlu1 %v376_v62, %s608_s2 }
 0x110   :  { %475 = vrot.lane.b32.xlu0 %v375_v53, %s613_s15 }
 0x111   :  { %461 = vrot.lane.b32.xlu1 %v375_v53, %s611_s14 }
 0x118   :  { %491 = vrot.lane.b32.xlu0 %v376_v62, %s614_s16 }
 0x119   :  { %477 = vrot.lane.b32.xlu1 %v376_v62, %s613_s15 }
 0x121   :  { %498 = vperm.xlu1 %590, %v735_v15  }
 0x14a   :  { %v382_v60 = vpop.permute.xlu2 %381 }
 0x152   :  { %v448_v50 = vpop.permute.xlu2 %447 }
 0x15a   :  { %v464_v17 = vpop.permute.xlu2 %463 }
 0x162   :  { %v398_v25 = vpop.permute.xlu0 %397 }
 0x163   :  { %v384_v39 = vpop.permute.xlu1 %383 }
 0x164   :  { %v385_v15 = vsel %vm37_vm1, %v382_v60, %v384_v39  ;;  %v386_v61 = vsel %vm37_vm1, %v384_v39, %v382_v60  ;;  %v446_v39 = vmul.f32 %v443_v9, %v440_v27  ;;  %v379_v27 = vadd.f32 %v377_v1, %v669_v2 }
 0x165   :  { %v388_v23 = vmul.f32 %v386_v61, %v43_v42  ;;  %v389_v44 = vmul.f32 %v385_v15, %v44_v47 }
 0x16a   :  { %v412_v21 = vpop.permute.xlu0 %411 }
 0x16b   :  { %v400_v22 = vpop.permute.xlu1 %399 }
 0x16c   :  { %v401_v63 = vsel %vm60_vm0, %v398_v25, %v400_v22  ;;  %v402_v4 = vsel %vm60_vm0, %v400_v22, %v398_v25  ;;  %v445_v25 = vmul.f32 %v443_v9, %v439_v29 }
 0x16d   :  { %v403_v36 = vmul.f32 %v402_v4, %v66_v40  ;;  %v404_v47 = vmul.f32 %v401_v63, %v67_v41 }
 0x16f   :  { %v409_v38 = vmul.f32 %v407_v6, %v403_v36 }
 0x172   :  { %v426_v30 = vpop.permute.xlu0 %425 }
 0x173   :  { %v414_v24 = vpop.permute.xlu1 %413 }
 0x174   :  { %v415_v20 = vsel %vm82_vm2, %v412_v21, %v414_v24  ;;  %v416_v37 = vsel %vm82_vm2, %v414_v24, %v412_v21 }
 0x175   :  { %v417_v43 = vmul.f32 %v416_v37, %v88_v48  ;;  %v395_v48 = vmul.f32 %v393_v5, %v388_v23 }
 0x177   :  { %v423_v9 = vmul.f32 %v421_v16, %v417_v43 }
 0x17a   :  { %v450_v31 = vpop.permute.xlu0 %449 }
 0x17b   :  { %v428_v32 = vpop.permute.xlu1 %427  ;;  %v451_v53 = vsel %vm141_vm4, %v448_v50, %v450_v31  ;;  %v452_v42 = vsel %vm141_vm4, %v450_v31, %v448_v50 }
 0x17c   :  { %v429_v0 = vsel %vm104_vm3, %v426_v30, %v428_v32  ;;  %v430_v26 = vsel %vm104_vm3, %v428_v32, %v426_v30  ;;  %v453_v40 = vmul.f32 %v451_v53, %v147_v57  ;;  %v454_v34 = vmul.f32 %v452_v42, %v148_v58 }
 0x17d   :  { %v431_v45 = vmul.f32 %v430_v26, %v110_v54  ;;  %v432_v46 = vmul.f32 %v429_v0, %v111_v55  ;;  %v418_v55 = vmul.f32 %v415_v20, %v89_v52  ;;  %v396_v30 = vmul.f32 %v393_v5, %v389_v44 }
 0x17e   :  { %v410_v52 = vmul.f32 %v407_v6, %v404_v47  ;;  %v460_v31 = vmul.f32 %v457_v8, %v454_v34 }
 0x17f   :  { %v437_v41 = vmul.f32 %v435_v12, %v431_v45  ;;  %v438_v21 = vmul.f32 %v435_v12, %v432_v46  ;;  %v424_v50 = vmul.f32 %v421_v16, %v418_v55  ;;  %v459_v12 = vmul.f32 %v457_v8, %v453_v40 }
 0x180   :  { %v508_v26 = vadd.f32 %v460_v31, %v446_v39 }
 0x181   :  { %v505_v5 = vadd.f32 %v437_v41, %v423_v9  ;;  %v506_v6 = vadd.f32 %v438_v21, %v424_v50  ;;  %v507_v0 = vadd.f32 %v459_v12, %v445_v25 }
 0x182   :  { %v476_v51 = vpop.permute.xlu0 %475 }
 0x183   :  { %v462_v18 = vpop.permute.xlu1 %461 }
 0x184   :  { %v465_v62 = vsel %vm163_vm5, %v462_v18, %v464_v17  ;;  %v466_v54 = vsel %vm163_vm5, %v464_v17, %v462_v18 }
 0x185   :  { %v467_v22 = vmul.f32 %v465_v62, %v169_v7  ;;  %v468_v60 = vmul.f32 %v466_v54, %v170_v10  ;;  %v490_v10 = vpop.permute.xlu2 %489 }
 0x187   :  { %v473_v32 = vmul.f32 %v471_v19, %v467_v22  ;;  %v474_v16 = vmul.f32 %v471_v19, %v468_v60  ;;  %v504_v19 = vadd.f32 %v410_v52, %v396_v30 }
 0x189   :  { %v514_v23 = vadd.f32 %v506_v6, %v504_v19 }
 0x18a   :  { %v492_v58 = vpop.permute.xlu0 %491 }
 0x18b   :  { %v478_v24 = vpop.permute.xlu1 %477  ;;  %v494_v8 = vsel %vm207_vm7, %v492_v58, %v490_v10 }
 0x18c   :  { %v479_v57 = vsel %vm185_vm6, %v476_v51, %v478_v24  ;;  %v480_v49 = vsel %vm185_vm6, %v478_v24, %v476_v51  ;;  %v493_v51 = vsel %vm207_vm7, %v490_v10, %v492_v58  ;;  %v496_v17 = vmul.f32 %v494_v8, %v214_v59 }
 0x18d   :  { %v481_v56 = vmul.f32 %v479_v57, %v191_v13  ;;  %v482_v7 = vmul.f32 %v480_v49, %v192_v14  ;;  %v378_v13 = vld [vmem:[%s1044_s7 + $0x8] sm:$0xff]  ;;  %v503_v14 = vadd.f32 %v409_v38, %v395_v48  ;;  %v495_v33 = vmul.f32 %v493_v51, %v213_v35 }
 0x18e   :  { %v380_v29 = vadd.f32 %v378_v13, %v674_v3 }
 0x18f   :  { %v487_v15 = vmul.f32 %v951_v28, %v481_v56  ;;  %v488_v61 = vmul.f32 %v951_v28, %v482_v7  ;;  %v513_v4 = vadd.f32 %v505_v5, %v503_v14 }
 0x191   :  { %v509_v18 = vadd.f32 %v487_v15, %v473_v32  ;;  %v510_v28 = vadd.f32 %v488_v61, %v474_v16 }
 0x193   :  { %v499_v63 = vpop.permute.xlu1 %498  ;;  %v515_v44 = vadd.f32 %v509_v18, %v507_v0  ;;  %v516_v20 = vadd.f32 %v510_v28, %v508_v26 }
 0x194   :  { %v501_v37 = vmul.f32 %v499_v63, %v495_v33  ;;  %v502_v45 = vmul.f32 %v499_v63, %v496_v17 }
 0x195   :  { %v517_v46 = vadd.f32 %v515_v44, %v513_v4  ;;  %v518_v53 = vadd.f32 %v516_v20, %v514_v23 }
 0x196   :  { %v511_v42 = vadd.f32 %v501_v37, %v379_v27  ;;  %v512_v36 = vadd.f32 %v502_v45, %v380_v29 }
 0x198   :  { %v519_v2 = vadd.f32 %v517_v46, %v511_v42  ;;  %v520_v47 = vadd.f32 %v518_v53, %v512_v36 }
 0x19a   :  { %v521_v3 = vmul.f32 0.5, %v519_v2  ;;  %v522_v62 = vmul.f32 0.5, %v520_v47 }
 0x19c   :  { %596 = vtanh.f32 %v521_v3 }
 0x19d   :  { %598 = vtanh.f32 %v522_v62 }
 0x1a2   :  { %v597_v35 = vpop.eup %596 }
 0x1a3   :  { %v599_v11 = vpop.eup %598  ;;  %v525_v59 = vadd.f32 1.0, %v597_v35 }
 0x1a4   :  { %v526_v54 = vadd.f32 1.0, %v599_v11 }
 0x1a5   :  { %v527_v43 = vmul.f32 %v525_v59, %v521_v3 }
 0x1a6   :  { %v528_v55 = vmul.f32 %v526_v54, %v522_v62 }
 0x1a7   :  { %529 = vst [vmem:[%s1045_s8] sm:$0xff] %v527_v43 }
 0x1a8   :  { %530 = vst [vmem:[%s1045_s8 + $0x8] sm:$0xff] %v528_v55 }

</bundles_post_ra>
